<compile_context>
chip_gen: v7x
topology: tpu7x:2x2x1
jax: 0.10.0
libtpu: 0.0.40
codegen_flags: <defaults>
</compile_context>

<pallas_src>
import math

import jax
import jax.numpy as jnp
import numpy as np
from jax import lax
from jax.experimental import pallas as pl
from jax.experimental.pallas import tpu as pltpu


_VMEM_LIMIT = 32 * 1024 * 1024   # safe on v5e/v6e (128 MiB) and v7x (64 MiB)


# ----------------------------------------------------------------------------
# Wrapped-diagonal sum helper (log-depth shift-and-halve tree).
#
#   _skew_diag_sum(v)[0, j] == sum_r v[r, j + r]
#
# All operations are static, contiguous block slices + adds at full vreg
# occupancy (no per-sublane slices, no [L, L] permutation matmuls).
# ----------------------------------------------------------------------------
def _skew_diag_sum(v):
    m, w = v.shape
    if m == 1:
        return v
    if m % 2 == 1:
        head = _skew_diag_sum(v[: m - 1, : w - 1])       # [1, w - m + 1]
        return head + v[m - 1 : m, m - 1 : w]            # peel the odd row
    h = m // 2
    # (top + shifted bottom): folds two rows per output row, shift h along lanes
    return _skew_diag_sum(v[:h, : w - h] + v[h:, h:])


# ----------------------------------------------------------------------------
# Kernel 1a: channel-mean of the circular cross-correlation
# (output_attention=False path: the full corr tensor is never written to HBM)
#
#   mean[b, tau] = (1/C) * sum_t K[b, t, :] . Q[b, (t+tau) % L, :]
#
# One MXU matmul (K @ Q^T, [L, L]) per batch; the circular wrap is handled by a
# column-doubled copy in VMEM scratch; the diagonal sums use the log-depth tree.
# ----------------------------------------------------------------------------
def _make_mean_kernel(use_bf16):
    def kernel(k_ref, q_ref, mean_ref, nd2_ref):
        k = k_ref[0]                                   # [L, C]
        q = q_ref[0]                                   # [L, C]
        L, C = k.shape
        if use_bf16:
            # bf16 operands feed the MXU at its bf16 peak (v6e/v7x); f32 accumulate.
            k = k.astype(jnp.bfloat16)
            q = q.astype(jnp.bfloat16)
        nd = jnp.einsum("tc,sc->ts", k, q,
                        preferred_element_type=jnp.float32)        # [L, L]
        # Column-doubled copy in VMEM scratch: circular roll -> contiguous window.
        nd2_ref[:, 0:L] = nd
        nd2_ref[:, L:2 * L] = nd
        # mean[tau] = (1/C) * sum_t nd2[t, t + tau]
        row = _skew_diag_sum(nd2_ref[...])                         # [1, L + 1]
        mean_ref[0] = row[:, 0:L] * (1.0 / C)
    return kernel


def mean_pallas(k2, q2, use_bf16=False):
    B, L, C = k2.shape
    out = pl.pallas_call(
        _make_mean_kernel(use_bf16),
        out_shape=jax.ShapeDtypeStruct((B, 1, L), jnp.float32),
        grid=(B,),
        in_specs=[
            pl.BlockSpec((1, L, C), lambda b: (b, 0, 0)),
            pl.BlockSpec((1, L, C), lambda b: (b, 0, 0)),
        ],
        out_specs=pl.BlockSpec((1, 1, L), lambda b: (b, 0, 0)),
        scratch_shapes=[pltpu.VMEM((L, 2 * L), jnp.float32)],
        compiler_params=pltpu.CompilerParams(
            dimension_semantics=("parallel",),
            vmem_limit_bytes=_VMEM_LIMIT),
    )(k2, q2)
    return out[:, 0, :]                                            # [B, L]


# ----------------------------------------------------------------------------
# Kernel 1b: full circular cross-correlation (only for output_attention=True).
# Tiled over tau on a second parallel grid axis -> aligned [tau_tile, C] output
# slabs and a small per-step program.  Q is doubled inside the kernel into a
# VMEM scratch (no HBM qd), windows are dynamic sublane-offset loads.
# TODO(synk): an rFFT/irFFT based O(L log L) formulation has no Pallas
# primitive; this direct form is O(L^2 C) on the VPU and is only used when
# output_attention=True.
# ----------------------------------------------------------------------------
def _pick_tau_tile(L):
    best = None
    for d in range(8, min(L, 128) + 1, 8):
        if L % d == 0:
            best = d
    return best if best is not None else L


def _make_corr_kernel(tau_tile):
    def kernel(k_ref, q_ref, corr_ref, qd_ref):
        k = k_ref[0]                                   # [L, C]
        L = k.shape[0]
        q = q_ref[0]
        qd_ref[0:L, :] = q                             # time-doubled Q in VMEM
        qd_ref[L:2 * L, :] = q
        base = pl.program_id(1) * tau_tile
        for r in range(tau_tile):                      # small static inner loop
            window = qd_ref[pl.ds(base + r, L), :]     # Q rolled by -(base+r)
            corr_ref[0, r:r + 1, :] = jnp.sum(window * k, axis=0, keepdims=True)
    return kernel


def corr_pallas(k2, q2):
    B, L, C = k2.shape
    tau_tile = _pick_tau_tile(L)
    n_tiles = L // tau_tile
    return pl.pallas_call(
        _make_corr_kernel(tau_tile),
        out_shape=jax.ShapeDtypeStruct((B, L, C), jnp.float32),
        grid=(B, n_tiles),
        in_specs=[
            pl.BlockSpec((1, L, C), lambda b, j: (b, 0, 0)),
            pl.BlockSpec((1, L, C), lambda b, j: (b, 0, 0)),
        ],
        out_specs=pl.BlockSpec((1, tau_tile, C), lambda b, j: (b, j, 0)),
        scratch_shapes=[pltpu.VMEM((2 * L, C), jnp.float32)],
        compiler_params=pltpu.CompilerParams(
            dimension_semantics=("parallel", "parallel"),
            vmem_limit_bytes=_VMEM_LIMIT),
    )(k2, q2)


# ----------------------------------------------------------------------------
# Kernel 2: time-delay aggregation (training-branch semantics):
#     out[b, j, c] = sum_i w[b, i] * V[b, (j + d_i) % L, c]
# V is doubled along time inside the kernel (VMEM scratch, no HBM vd); each of
# the top_k terms is one dynamic-offset window load + a VPU scale-add that
# accumulates directly into the output block.
# ----------------------------------------------------------------------------
def _make_agg_kernel(top_k):
    def kernel(delay_ref, weight_ref, v_ref, out_ref, vd_ref):
        b = pl.program_id(0)
        L = v_ref.shape[1]
        v = v_ref[0]                                   # [L, Cv_tile]
        vd_ref[0:L, :] = v                             # time-doubled V in VMEM
        vd_ref[L:2 * L, :] = v
        for i in range(top_k):                         # top_k ~ log(L): small
            d = delay_ref[i]                           # data-dependent delay (SMEM)
            w = weight_ref[b, i]                       # softmax weight (SMEM)
            pattern = vd_ref[pl.ds(d, L), :].astype(jnp.float32) * w
            if i == 0:
                out_ref[0] = pattern                   # init + accumulate in-place
            else:
                out_ref[0] = out_ref[0] + pattern
    return kernel


def agg_pallas(v2, delays, weights):
    B, L, Cv = v2.shape
    top_k = int(delays.shape[0])
    # Second parallel grid axis over channel tiles keeps both v7x TensorCores
    # busy when B == 1.
    if B == 1 and Cv % 256 == 0:
        cv_tile = Cv // 2
    else:
        cv_tile = Cv
    n_cv = Cv // cv_tile
    grid_spec = pltpu.PrefetchScalarGridSpec(
        num_scalar_prefetch=2,             # delays, weights -> SMEM
        grid=(B, n_cv),
        in_specs=[pl.BlockSpec((1, L, cv_tile), lambda b, j, d, w: (b, 0, j))],
        out_specs=pl.BlockSpec((1, L, cv_tile), lambda b, j, d, w: (b, 0, j)),
        scratch_shapes=[pltpu.VMEM((2 * L, cv_tile), v2.dtype)],
    )
    return pl.pallas_call(
        _make_agg_kernel(top_k),
        out_shape=jax.ShapeDtypeStruct((B, L, Cv), jnp.float32),
        grid_spec=grid_spec,
        compiler_params=pltpu.CompilerParams(
            dimension_semantics=("parallel", "parallel"),
            vmem_limit_bytes=_VMEM_LIMIT),
    )(delays, weights, v2)


# ----------------------------------------------------------------------------
# Full forward (non-monarch path of AutoCorrelation.forward)
# ----------------------------------------------------------------------------
def autocorrelation_forward(queries, keys, values, attn_mask=None,
                            factor=1, output_attention=False,
                            use_bf16_matmul=False,
                            agg_value_dtype=jnp.float32):
    # attn_mask is accepted but unused and dropout is never applied, exactly
    # like the PyTorch non-monarch path.  Training-branch (batch-averaged
    # top-k) aggregation semantics (module default self.training == True).
    # TODO(synk): MonarchAttention branch (use_monarch=True) not implemented.
    B, L, H, E = queries.shape
    _, S, _, D = values.shape
    if L > S:
        zeros_v = jnp.zeros((B, L - S, H, D), dtype=values.dtype)
        zeros_k = jnp.zeros((B, L - S, H, E), dtype=keys.dtype)
        values = jnp.concatenate([values, zeros_v], axis=1)
        keys = jnp.concatenate([keys, zeros_k], axis=1)
    else:
        values = values[:, :L]
        keys = keys[:, :L]

    C = H * E
    Cv = H * D
    # Free reshapes: fuse heads & channels onto lanes, keep time on sublanes.
    q2 = queries.reshape(B, L, C).astype(jnp.float32)
    k2 = keys.reshape(B, L, C).astype(jnp.float32)
    v2 = values.reshape(B, L, Cv).astype(agg_value_dtype)

    # (1) period-based dependencies discovery (channel mean of corr on the MXU).
    mean_value = mean_pallas(k2, q2, use_bf16=use_bf16_matmul)        # [B, L]
    corr = corr_pallas(k2, q2) if output_attention else None          # [B, L, C]

    # (2) time-delay aggregation (training-branch semantics)
    top_k = int(factor * math.log(L))
    if top_k > 0:
        index = lax.top_k(jnp.mean(mean_value, axis=0), top_k)[1]     # [top_k]
        weights = jnp.take(mean_value, index, axis=1)                 # [B, top_k]
        tmp_corr = jax.nn.softmax(weights, axis=-1)                   # [B, top_k]
        agg = agg_pallas(v2, index.astype(jnp.int32),
                         tmp_corr.astype(jnp.float32))                # [B, L, Cv]
    else:
        agg = jnp.zeros((B, L, Cv), jnp.float32)

    V = agg.reshape(B, L, H, D)
    if output_attention:
        return V, corr.reshape(B, L, H, E)
    return V, None


# ----------------------------------------------------------------------------
# Pure-JAX reference (uses jnp.fft) for correctness checks
# ----------------------------------------------------------------------------
def reference_forward(queries, keys, values, factor=1):
    B, L, H, E = queries.shape
    values = values[:, :L]
    keys = keys[:, :L]
    q = jnp.transpose(queries, (0, 2, 3, 1)).astype(jnp.float32)
    k = jnp.transpose(keys, (0, 2, 3, 1)).astype(jnp.float32)
    v = jnp.transpose(values, (0, 2, 3, 1)).astype(jnp.float32)
    q_fft = jnp.fft.rfft(q, axis=-1)
    k_fft = jnp.fft.rfft(k, axis=-1)
    corr = jnp.fft.irfft(q_fft * jnp.conj(k_fft), n=L, axis=-1)       # [B, H, E, L]
    top_k = int(factor * math.log(L))
    mean_value = jnp.mean(corr, axis=(1, 2))
    index = lax.top_k(jnp.mean(mean_value, axis=0), top_k)[1]
    weights = jnp.take(mean_value, index, axis=1)
    tmp_corr = jax.nn.softmax(weights, axis=-1)
    agg = jnp.zeros_like(v)
    for i in range(top_k):
        pattern = jnp.roll(v, -int(index[i]), axis=-1)
        agg = agg + pattern * tmp_corr[:, i][:, None, None, None]
    return (jnp.transpose(agg, (0, 3, 1, 2)),
            jnp.transpose(corr, (0, 3, 1, 2)))


if __name__ == "__main__":
    key = jax.random.PRNGKey(0)
    kq, kk, kv = jax.random.split(key, 3)

    B, L, H, E = 2, 16, 4, 8   # seq=16, heads=4, head-dim=8
    S, D = 16, 8

    queries = jax.random.normal(kq, (B, L, H, E), dtype=jnp.float32)
    keys_ = jax.random.normal(kk, (B, S, H, E), dtype=jnp.float32)
    values = jax.random.normal(kv, (B, S, H, D), dtype=jnp.float32)

    # Default path: output_attention=False (corr never materialized)
    V, attn = autocorrelation_forward(queries, keys_, values, attn_mask=None,
                                      factor=1, output_attention=False)
    V = jax.block_until_ready(V)
    assert V.shape == (B, L, H, D)
    assert attn is None

    V_ref, corr_ref = reference_forward(queries, keys_, values, factor=1)
    V_ref = jax.block_until_ready(V_ref)
    np.testing.assert_allclose(np.asarray(V), np.asarray(V_ref),
                               rtol=2e-3, atol=2e-3)

    # Attention-output path exercises the full-corr kernel
    V2, attn2 = autocorrelation_forward(queries, keys_, values, attn_mask=None,
                                        factor=1, output_attention=True)
    V2 = jax.block_until_ready(V2)
    attn2 = jax.block_until_ready(attn2)
    np.testing.assert_allclose(np.asarray(V2), np.asarray(V_ref),
                               rtol=2e-3, atol=2e-3)
    np.testing.assert_allclose(np.asarray(attn2), np.asarray(corr_ref),
                               rtol=2e-3, atol=2e-3)

    print("KERNEL_OK")
</pallas_src>

<mosaic_0001>
module attributes {stable_mosaic.version = 11 : i64} {
  func.func @kernel(%arg0: i32, %arg1: memref<1x16x32xf32, #tpu.memory_space<vmem>>, %arg2: memref<1x16x32xf32, #tpu.memory_space<vmem>>, %arg3: memref<1x1x16xf32, #tpu.memory_space<vmem>>, %arg4: memref<16x32xf32, #tpu.memory_space<vmem>>) attributes {dimension_semantics = [#tpu.dimension_semantics<parallel>], iteration_bounds = array<i64: 2>, scalar_prefetch = 0 : i64, scratch_operands = 1 : i64, tpu.core_type = #tpu.core_type<tc>, window_params = [{transform_indices = @transform_0, window_bounds = array<i64: 1, 16, 32>}, {transform_indices = @transform_1, window_bounds = array<i64: 1, 16, 32>}, {transform_indices = @transform_2, window_bounds = array<i64: 1, 1, 16>}]} {
    %c0 = arith.constant 0 : index
    %c0_0 = arith.constant 0 : index
    %c0_1 = arith.constant 0 : index
    %0 = vector.load %arg1[%c0, %c0_0, %c0_1] : memref<1x16x32xf32, #tpu.memory_space<vmem>>, vector<1x16x32xf32>
    %1 = vector.shape_cast %0 : vector<1x16x32xf32> to vector<16x32xf32>
    %c0_2 = arith.constant 0 : index
    %c0_3 = arith.constant 0 : index
    %c0_4 = arith.constant 0 : index
    %2 = vector.load %arg2[%c0_2, %c0_3, %c0_4] : memref<1x16x32xf32, #tpu.memory_space<vmem>>, vector<1x16x32xf32>
    %3 = vector.shape_cast %2 : vector<1x16x32xf32> to vector<16x32xf32>
    "tpu.trace_start"() <{level = 10 : i32, message = "tc,sc->ts"}> : () -> ()
    %cst = arith.constant dense<0.000000e+00> : vector<16x16xf32>
    %4 = tpu.matmul %1, %3, %cst {dimension_numbers = #tpu.dot_dimension_numbers<[1], [1], [0], [0], [0, 0, 1, 0], [], []>} : vector<16x32xf32>, vector<16x32xf32>, vector<16x16xf32> -> vector<16x16xf32>
    "tpu.trace_stop"() : () -> ()
    %c0_5 = arith.constant 0 : index
    %c0_6 = arith.constant 0 : index
    %5 = vector.load %arg4[%c0_5, %c0_6] : memref<16x32xf32, #tpu.memory_space<vmem>>, vector<16x16xf32>
    tpu.vector_store %arg4[%c0_5, %c0_6], %4 {strides = array<i32>} : memref<16x32xf32, #tpu.memory_space<vmem>>, vector<16x16xf32>,
    %c0_7 = arith.constant 0 : index
    %c16 = arith.constant 16 : index
    %6 = vector.load %arg4[%c0_7, %c16] : memref<16x32xf32, #tpu.memory_space<vmem>>, vector<16x16xf32>
    tpu.vector_store %arg4[%c0_7, %c16], %4 {strides = array<i32>} : memref<16x32xf32, #tpu.memory_space<vmem>>, vector<16x16xf32>,
    %c0_8 = arith.constant 0 : index
    %c0_9 = arith.constant 0 : index
    %7 = vector.load %arg4[%c0_8, %c0_9] : memref<16x32xf32, #tpu.memory_space<vmem>>, vector<16x32xf32>
    %8 = vector.extract_strided_slice %7 {offsets = [0, 0], sizes = [8, 24], strides = [1, 1]} : vector<16x32xf32> to vector<8x24xf32>
    %9 = vector.extract_strided_slice %7 {offsets = [8, 8], sizes = [8, 24], strides = [1, 1]} : vector<16x32xf32> to vector<8x24xf32>
    %10 = arith.addf %8, %9 : vector<8x24xf32>
    %11 = vector.extract_strided_slice %10 {offsets = [0, 0], sizes = [4, 20], strides = [1, 1]} : vector<8x24xf32> to vector<4x20xf32>
    %12 = vector.extract_strided_slice %10 {offsets = [4, 4], sizes = [4, 20], strides = [1, 1]} : vector<8x24xf32> to vector<4x20xf32>
    %13 = arith.addf %11, %12 : vector<4x20xf32>
    %14 = vector.extract_strided_slice %13 {offsets = [0, 0], sizes = [2, 18], strides = [1, 1]} : vector<4x20xf32> to vector<2x18xf32>
    %15 = vector.extract_strided_slice %13 {offsets = [2, 2], sizes = [2, 18], strides = [1, 1]} : vector<4x20xf32> to vector<2x18xf32>
    %16 = arith.addf %14, %15 : vector<2x18xf32>
    %17 = vector.extract_strided_slice %16 {offsets = [0, 0], sizes = [1, 17], strides = [1, 1]} : vector<2x18xf32> to vector<1x17xf32>
    %18 = vector.extract_strided_slice %16 {offsets = [1, 1], sizes = [1, 17], strides = [1, 1]} : vector<2x18xf32> to vector<1x17xf32>
    %19 = arith.addf %17, %18 : vector<1x17xf32>
    %20 = vector.extract_strided_slice %19 {offsets = [0, 0], sizes = [1, 16], strides = [1, 1]} : vector<1x17xf32> to vector<1x16xf32>
    %cst_10 = arith.constant 3.125000e-02 : f32
    %21 = vector.broadcast %cst_10 : f32 to vector<1x16xf32>
    %22 = arith.mulf %20, %21 : vector<1x16xf32>
    %c0_11 = arith.constant 0 : index
    %c0_12 = arith.constant 0 : index
    %c0_13 = arith.constant 0 : index
    %23 = vector.load %arg3[%c0_11, %c0_12, %c0_13] : memref<1x1x16xf32, #tpu.memory_space<vmem>>, vector<1x1x16xf32>
    %24 = vector.shape_cast %23 : vector<1x1x16xf32> to vector<1x16xf32>
    %25 = vector.shape_cast %22 : vector<1x16xf32> to vector<1x1x16xf32>
    tpu.vector_store %arg3[%c0_11, %c0_12, %c0_13], %25 {strides = array<i32>} : memref<1x1x16xf32, #tpu.memory_space<vmem>>, vector<1x1x16xf32>,
    return
  }
  func.func @transform_0(%arg0: i32) -> (i32, i32, i32) {
    %c0_i32 = arith.constant 0 : i32
    %c0_i32_0 = arith.constant 0 : i32
    %c0_i32_1 = arith.constant 0 : i32
    return %arg0, %c0_i32, %c0_i32_0 : i32, i32, i32
  }
  func.func @transform_1(%arg0: i32) -> (i32, i32, i32) {
    %c0_i32 = arith.constant 0 : i32
    %c0_i32_0 = arith.constant 0 : i32
    %c0_i32_1 = arith.constant 0 : i32
    return %arg0, %c0_i32, %c0_i32_0 : i32, i32, i32
  }
  func.func @transform_2(%arg0: i32) -> (i32, i32, i32) {
    %c0_i32 = arith.constant 0 : i32
    %c0_i32_0 = arith.constant 0 : i32
    %c0_i32_1 = arith.constant 0 : i32
    return %arg0, %c0_i32, %c0_i32_0 : i32, i32, i32
  }
}

</mosaic_0001>

<bundles_post_ra>
// kernel: tpu_custom_call.1
= control target key start
LH: loop header
LB: loop body
LE: loop exit
PB: predicated region body
PF: predicated region fallthrough
CT: control target
= control target key end

     0   :  { %7 = vsyncpa [#allocation4], 0  ;;  %s912_s0 = inlined_call_operand.hbm [shape: f32[2,16,32], index: 0, kind: input, shape index: {}]   ;;  %s913_s1 = inlined_call_operand.hbm [shape: f32[2,16,32], index: 1, kind: input, shape index: {}]   ;;  %s914_s2 = inlined_call_operand.hbm [shape: f32[2,1,16], index: 2, kind: output, shape index: {}]  }
   0x1   :  { %9 = vsyncpa [#allocation4 + $0x1], 0 }
   0x2   :  { %10 = vsyncpa [#allocation7], 0 }
   0x3   :  { %12 = vsyncpa [#allocation7 + $0x1], 0 }
   0x4   :  { %13 = vsyncpa [#allocation5], 0 }
   0x5   :  { %15 = vsyncpa [#allocation5 + $0x1], 0  ;;  %s690_s9 = smov 0   ;;  %s692_s10 = smov 0  }
   0x6   :  { %s694_s11 = smov 0   ;;  %s696_s12 = smov 0  }
   0x7 LB: > { %s711_s13 = sadd.s32 4294967295, %s663_s12   ;;  %s437_s14 = sadd.s32 4294967294, %s663_s12   ;;  %s663_s12 = sphi %s696_s12, %s930_s12   ;;  %s659_s11 = sphi %s694_s11, %s929_s11   ;;  %s655_s10 = sphi %s692_s10, %s928_s10   ;;  %s651_s9 = sphi %s690_s9, %s927_s9  }
   0x8   : > { %s715_s15 = sadd.s32 1, %s663_s12   ;;  %s28_s16 = sadd.s32 1, %s659_s11 }
   0x9   : > { %s25_s17 = ssub.s32 %s663_s12, %s715_s15  ;;  %p35_p0 = scmp.ne.s32.totalorder %s659_s11, %s655_s10 }
   0xa   : > { %p26_p1 = scmp.eq.s32.totalorder %s25_s17, 0  ;;  %p36_p2 = scmp.eq.s32.totalorder %s663_s12, 0 }
   0xb   : > { %p41_p3 = scmp.ne.s32.totalorder %s655_s10, %s651_s9  ;;  %p42_p4 = scmp.eq.s32.totalorder %s711_s13, 0 }
   0xc   : > { %s727_s18 = scalar_select %p26_p1, %s659_s11, %s28_s16  }
   0xd   : > { %p729_p5 = por %p36_p2, %p35_p0  ;;  %p733_p6 = por %p42_p4, %p41_p3 }
   0xe   : > { %p91_p7 = scmp.eq.s32.totalorder %s711_s13, 1  ;;  %p97_p8 = scmp.eq.s32.totalorder %s437_s14, 1 }
   0xf   : > { %s918_s20 = scalar_select %p733_p6, 1, 0 }
  0x10   : > { %p492_p10 = scmp.lt.s32.totalorder %s663_s12, 2  ;;  %p740_p11 = por %p91_p7, %p35_p0 }
  0x11   : > { %p744_p12 = por %p97_p8, %p41_p3  ;;  %s749_s23 = sand.u32 1, %s659_s11  }
  0x12   : > { %s919_s21 = scalar_select %p740_p11, 1, 0 }
  0x13   : > { %s920_s22 = scalar_select %p744_p12, 1, 0 }
  0x14   : > { %s456_s24 = sshll.u32 %s663_s12, 8  ;;  %s440_s25 = sshll.u32 %s749_s23, 4 }
  0x15   : > { %s758_s28 = scalar_lea.hbm %s912_s0, %s456_s24  ;;  %s121_s29 = scalar_lea.vmem [#allocation3], %s440_s25 }
  0x16   : > { %s128_s30 = sshll.u32 %s121_s29, 4  ;;  %p764_p13 = pnand %p492_p10, %p729_p5  ;;  %s768_s30 = int_to_ptr.vmem [resolvable:$true] %s128_s30 }
  0x17   : > { %s118_s4 = scalar_lea.sflag [#allocation4], %s749_s23  ;;  %s533_s5 = scalar_lea.hbm %s758_s28, 256 }
  0x18   : > { %p534_p0 = scmp.ne.s32.totalorder %s758_s28, %s533_s5  ;;  %p535_p1 = pneg %p764_p13 }
  0x19   : > { %s538_s8 = scalar_lea.hbm %s912_s0, 512  ;;  %p539_p4 = scmp.lt.u32.totalorder %s758_s28, %s912_s0 }
  0x1a   : > { %p536_p2 = pnand %p535_p1, %p534_p0  ;;  %p540_p5 = scmp.lt.u32.totalorder %s538_s8, %s533_s5 }
  0x1b   : > { %p542_p8 = scmp.lt.u32.totalorder %s533_s5, %s758_s28 }
  0x1c   : > { %p537_p3 = pneg %p536_p2  ;;  %p541_p7 = por %p540_p5, %p539_p4 }
  0x1e   : > { %p543_p10 = por %p542_p8, %p541_p7 }
  0x20   : > { %p544_p9 = pnand %p543_p10, %p537_p3 }
  0x22   : > { %547 = shalt.err (!%p544_p9)
}
  0x23   : > { %s548_s17 = scalar_lea.vmem %s768_s30, 256  ;;  %s665_s19 = smov [#allocation3]  }
  0x24   : > { %p549_p0 = scmp.ne.s32.totalorder %s768_s30, %s548_s17  ;;  %s553_s26 = sshll.u32 %s665_s19, 4  ;;  %s554_s26 = int_to_ptr.vmem [resolvable:$false] %s553_s26 }
  0x25   : > { %s555_s27 = scalar_lea.vmem %s554_s26, 512  ;;  %p556_p11 = scmp.lt.s32.totalorder %s768_s30, %s554_s26 }
  0x26   : > { %p551_p2 = pnand %p549_p0, %p535_p1  ;;  %p557_p4 = scmp.lt.s32.totalorder %s555_s27, %s548_s17 }
  0x28   : > { %p552_p12 = pneg %p551_p2  ;;  %p558_p5 = por %p557_p4, %p556_p11 }
  0x2a   : > { %p559_p7 = pnand %p558_p5, %p552_p12 }
  0x2c   : > { %562 = shalt.err (!%p559_p7)
}
  0x2d   : > { %s666_s29 = smov 128   ;;  %s667_s5 = smov 8  }
  0x2e   : > { %484 = dma.hbm_to_vmem [thread:$0]  (!%p764_p13), %s758_s28, 256, %s768_s30, %s118_s4, %s666_s29, %s666_s29, %s667_s5  }
  0x2f   : > { %p446_p9 = scmp.ge.s32.totalorder %s663_s12, 1  ;;  %p157_p11 = scmp.lt.s32.totalorder %s663_s12, 3 }
  0x30   : > { %s812_s14 = scalar_lea.hbm %s913_s1, %s456_s24  ;;  %s142_s16 = scalar_lea.vmem [#allocation6], %s440_s25 }
  0x31   : > { %p803_p12 = pnand %p446_p9, %p157_p11  ;;  %s149_s17 = sshll.u32 %s142_s16, 4  ;;  %s816_s17 = int_to_ptr.vmem [resolvable:$true] %s149_s17 }
  0x32   : > { %s139_s28 = scalar_lea.sflag [#allocation7], %s749_s23  ;;  %s563_s30 = scalar_lea.hbm %s812_s14, 256 }
  0x33   : > { %p564_p3 = scmp.ne.s32.totalorder %s812_s14, %s563_s30  ;;  %s568_s24 = scalar_lea.hbm %s913_s1, 512 }
  0x34   : > { %p569_p0 = scmp.lt.u32.totalorder %s812_s14, %s913_s1  ;;  %p570_p2 = scmp.lt.u32.totalorder %s568_s24, %s563_s30 }
  0x35   : > { %p566_p8 = pnand %p564_p3, %p535_p1  ;;  %p572_p5 = scmp.lt.u32.totalorder %s563_s30, %s812_s14 }
  0x36   : > { %p571_p4 = por %p570_p2, %p569_p0 }
  0x37   : > { %p567_p10 = pneg %p566_p8 }
  0x38   : > { %p573_p7 = por %p572_p5, %p571_p4 }
  0x3a   : > { %p574_p9 = pnand %p573_p7, %p567_p10 }
  0x3c   : > { %577 = shalt.err (!%p574_p9)
}
  0x3d   : > { %s578_s25 = scalar_lea.vmem %s816_s17, 256  ;;  %s668_s7 = smov [#allocation6]  }
  0x3e   : > { %p579_p11 = scmp.ne.s32.totalorder %s816_s17, %s578_s25  ;;  %s583_s8 = sshll.u32 %s668_s7, 4  ;;  %s584_s8 = int_to_ptr.vmem [resolvable:$false] %s583_s8 }
  0x3f   : > { %s585_s16 = scalar_lea.vmem %s584_s8, 512  ;;  %p586_p6 = scmp.lt.s32.totalorder %s816_s17, %s584_s8 }
  0x40   : > { %p581_p3 = pnand %p579_p11, %p535_p1  ;;  %p587_p0 = scmp.lt.s32.totalorder %s585_s16, %s578_s25 }
  0x42   : > { %p582_p8 = pneg %p581_p3  ;;  %p588_p2 = por %p587_p0, %p586_p6 }
  0x44   : > { %p589_p4 = pnand %p588_p2, %p582_p8 }
  0x46   : > { %592 = shalt.err (!%p589_p4)
}
  0x47   : > { %487 = dma.hbm_to_vmem [thread:$0]  (!%p764_p13), %s812_s14, 256, %s816_s17, %s139_s28, %s666_s29, %s666_s29, %s667_s5  }
  0x48   : > { %161 = sbr.rel (%p803_p12) target bundleno = 918 (0x396), region = 28  ;;  %s850_s30 = sand.u32 (!%p803_p12), 1, %s655_s10  }
  0x49   : > { %s447_s4 = sshll.u32 (!%p803_p12), %s850_s30, 4  ;;  %s164_s19 = scalar_lea.sflag (!%p803_p12), [#allocation4], %s850_s30 }
  0x4a   : > { %s167_s3 = scalar_lea.vmem (!%p803_p12), [#allocation3], %s447_s4  ;;  %p923_p6 = scmp.ne.s32.totalorder (!%p803_p12), %s918_s20, 0 }
  0x4f   : > { %638 = dma.done.wait (%p923_p6), %s164_s19, 256  }
  0x50   : > { %640 = vsyncadd (%p923_p6), %s164_s19, 4294967040  ;;  %s173_s23 = scalar_lea.sflag [#allocation7], %s850_s30  ;;  %s176_s29 = scalar_lea.vmem [#allocation6], %s447_s4 }
  0x51   : > { %642 = dma.done.wait (%p923_p6), %s173_s23, 256  }
  0x52   : > { %644 = vsyncadd (%p923_p6), %s173_s23, 4294967040  ;;  %vm205_vm0 = vcmask 261120   ;;  %v203_v0 = vld [vmem:[%s176_s29] sm:$0xff]  ;;  %v204_v1 = vld [vmem:[%s176_s29 + $0x8] sm:$0xff]  ;;  %vm293_vm2 = vcmask 130048   ;;  %s669_s5 = smov 16  }
  0x53   : > { %vm470_vm1 = vmpackc.low %vm205_vm0, %vm205_vm0  ;;  %v201_v2 = vld [vmem:[%s167_s3] sm:$0xff]  ;;  %v469_v3 = vpack.c.bf16 %v204_v1, %v203_v0  ;;  %v202_v4 = vld [vmem:[%s167_s3 + $0x8] sm:$0xff]  ;;  %vm304_vm3 = vcmask 261248   ;;  %s670_s20 = smov 120   ;;  %s671_s6 = smov 124   ;;  %vm333_vm4 = vcmask 122880  }
  0x54   : > { %466 = vmatprep.mubr.msk.f32.mxu0 %vm205_vm0, %v201_v2  ;;  %s672_s14 = smov 126   ;;  %s673_s17 = smov 127  }
  0x55   : > { %471 = vmatprep.subr.msk.bf16.mxu0 %vm470_vm1, %v469_v3  ;;  %s453_s28 = sshll.u32 %s711_s13, 4  ;;  %s200_s24 = scalar_lea.vmem [#allocation8], %s850_s30 }
  0x56   : > { %474 = vmatpush3.bf16.xpose.msk.msra.mxu0 %vm470_vm1, %v469_v3  ;;  %s348_s26 = sshll.u32 %s200_s24, 4  ;;  %s868_s7 = scalar_lea.hbm %s914_s2, %s453_s28  ;;  %s870_s26 = int_to_ptr.vmem [resolvable:$true] %s348_s26 }
  0x57   : > { %s336_s8 = scalar_lea.sflag [#allocation5], %s850_s30  ;;  %s593_s16 = scalar_lea.vmem %s870_s26, 16 }
  0x58   : > { %p594_p13 = scmp.ne.s32.totalorder %s870_s26, %s593_s16  ;;  %p924_p1 = scmp.ne.s32.totalorder %s919_s21, 0 }
  0x59   : > { %s674_s13 = smov [#allocation8]  }
  0x5a   : > { %p595_p12 = pnand %p594_p13, %p924_p1  ;;  %s597_s4 = sshll.u32 %s674_s13, 4  ;;  %s598_s4 = int_to_ptr.vmem [resolvable:$false] %s597_s4 }
  0x5b   : > { %s599_s19 = scalar_lea.vmem %s598_s4, 32  ;;  %p600_p5 = scmp.lt.s32.totalorder %s870_s26, %s598_s4 }
  0x5c   : > { %p596_p10 = pneg %p595_p12  ;;  %p601_p7 = scmp.lt.s32.totalorder %s599_s19, %s593_s16 }
  0x5d   : > { %467 = vmatmul.mubr.msk.f32.vlgmr.msra.gmra.mrb[0].mxu0 %vm205_vm0, %v202_v4 }
  0x5e   : > { %p602_p9 = por %p601_p7, %p600_p5 }
  0x60   : > { %p603_p11 = pnand %p602_p9, %p596_p10 }
 0x130   : > { %v468_v5 = vpop.f32.mrb[0].mxu0 }
 0x131   : > { %295 = vst.msk [vmem:[#allocation2 + $0x8] sm:$0xff] %vm293_vm2, %v468_v5  ;;  %300 = vrot.lane.b32.xlu0 %v468_v5, %s669_s5  ;;  %v284_v6 = vpop.f32.mrb[1].mxu0 }
 0x132   : > { %294 = vst.msk [vmem:[#allocation2] sm:$0xff] %vm293_vm2, %v284_v6 }
 0x135   : > { %298 = vrot.lane.b32.xlu0 %v284_v6, %s669_s5 }
 0x1a3   : > { %v301_v7 = vpop.permute.xlu0 %300 }
 0x1a4   : > { %306 = vst.msk [vmem:[#allocation2 + $0x8] sm:$0xff] %vm304_vm3, %v301_v7 }
 0x1a7   : > { %v299_v8 = vpop.permute.xlu0 %298 }
 0x1a8   : > { %305 = vst.msk [vmem:[#allocation2] sm:$0xff] %vm304_vm3, %v299_v8 }
 0x1ab   : > { %v308_v9 = vld [vmem:[#allocation2 + $0x8] sm:$0xff] }
 0x1ac   : > { %310 = vrot.lane.b32.xlu1 %v308_v9, %s670_s20 }
 0x1af   : > { %v307_v11 = vld [vmem:[#allocation2] sm:$0xff] }
 0x21e   : > { %v311_v10 = vpop.permute.xlu1 %310 }
 0x21f   : > { %v313_v12 = vadd.f32 %v311_v10, %v307_v11 }
 0x221   : > { %v315_v13 = vrot.slane %v313_v12, 4 }
 0x223   : > { %316 = vrot.lane.b32.xlu1 %v315_v13, %s671_s6 }
 0x295   : > { %v317_v14 = vpop.permute.xlu1 %316 }
 0x296   : > { %v319_v15 = vadd.f32 %v317_v14, %v313_v12 }
 0x298   : > { %v321_v16 = vrot.slane %v319_v15, 2 }
 0x29a   : > { %322 = vrot.lane.b32.xlu0 %v321_v16, %s672_s14 }
 0x30c   : > { %v323_v17 = vpop.permute.xlu0 %322 }
 0x30d   : > { %v325_v18 = vadd.f32 %v323_v17, %v319_v15 }
 0x30f   : > { %v327_v19 = vrot.slane %v325_v18, 1 }
 0x311   : > { %328 = vrot.lane.b32.xlu1 %v327_v19, %s673_s17 }
 0x383   : > { %v329_v20 = vpop.permute.xlu1 %328 }
 0x384   : > { %v331_v21 = vadd.f32 %v329_v20, %v325_v18 }
 0x386   : > { %v332_v22 = vmul.f32 0.03125, %v331_v21 }
 0x388   : > { %334 = vst.msk [vmem:[%s200_s24] sm:$0x1] %vm333_vm4, %v332_v22 }
 0x389   : > { %606 = shalt.err (!%p603_p11)
}
 0x38a   : > { %s607_s30 = scalar_lea.hbm %s868_s7, 16  ;;  %s611_s29 = scalar_lea.hbm %s914_s2, 32 }
 0x38b   : > { %p608_p3 = scmp.ne.s32.totalorder %s868_s7, %s607_s30  ;;  %p612_p2 = scmp.lt.u32.totalorder %s868_s7, %s914_s2 }
 0x38c   : > { %p613_p4 = scmp.lt.u32.totalorder %s611_s29, %s607_s30  ;;  %p615_p13 = scmp.lt.u32.totalorder %s607_s30, %s868_s7 }
 0x38d   : > { %p609_p8 = pnand %p608_p3, %p924_p1 }
 0x38e   : > { %p614_p6 = por %p613_p4, %p612_p2 }
 0x38f   : > { %p610_p0 = pneg %p609_p8 }
 0x390   : > { %p616_p12 = por %p615_p13, %p614_p6 }
 0x392   : > { %p617_p10 = pnand %p616_p12, %p610_p0 }
 0x394   : > { %620 = shalt.err (!%p617_p10)
}
 0x395   : > { %479 = dma.vmem_to_hbm [thread:$0]  (%p924_p1), %s870_s26, 16, %s868_s7, %s336_s8  }
 0x396 PF: > { %s360_s6 = sand.u32 1, %s651_s9   ;;  %p925_p5 = scmp.ne.s32.totalorder %s920_s22, 0 }
 0x397   : > { %p926_p7 = scmp.ge.s32.totalorder %s663_s12, 2  ;;  %s361_s14 = scalar_lea.sflag [#allocation5], %s360_s6 }
 0x399   : > { %p489_p9 = pnand %p926_p7, %p925_p5 }
 0x39b   : > { %646 = dma.done.wait (!%p489_p9), %s361_s14, 16  }
 0x39c   : > { %648 = vsyncadd (!%p489_p9), %s361_s14, 4294967280  ;;  %p18_p11 = scmp.ge.s32.totalorder %s715_s15, 4   ;;  %s927_s9 = smov %s655_s10 }
 0x39d   : > { %s928_s10 = smov %s659_s11  ;;  %s929_s11 = smov %s727_s18 }
 0x39e   : > { %s930_s12 = smov %s715_s15  ;;  %20 = sbr.rel (!%p18_p11) target bundleno = 7 (0x7), region = 86 }
 0x3a5   :  { %365 = vsyncpa [#allocation4], 1 }
 0x3a6   :  { %367 = vsyncpa [#allocation4 + $0x1], 1 }
 0x3a7   :  { %368 = vsyncpa [#allocation7], 1 }
 0x3a8   :  { %370 = vsyncpa [#allocation7 + $0x1], 1 }
 0x3a9   :  { %371 = vsyncpa [#allocation5], 1 }
 0x3aa   :  { %373 = vsyncpa [#allocation5 + $0x1], 1 }

</bundles_post_ra>
